<compile_context>
chip_gen: v7x
topology: tpu7x:2x2x1
jax: 0.10.0
libtpu: 0.0.40
codegen_flags: <defaults>
</compile_context>

<pallas_src>
import functools

import jax
import jax.numpy as jnp
from jax.experimental import pallas as pl
from jax.experimental.pallas import tpu as pltpu


def _round_up(n, m):
    return (n + m - 1) // m * m


def _gelu_exact(x):
    # transformers / mmf 'gelu' == exact gelu: x * 0.5 * (1 + erf(x / sqrt(2)))
    return x * 0.5 * (1.0 + jax.lax.erf(x * 0.7071067811865475))


# ----------------------------------------------------------------------------
# One-time parameter preparation (hoisted out of the forward path).
# PyTorch layouts in: Linear weight (out, in); tied embedding (V, H).
# ----------------------------------------------------------------------------
def prepare_bert_heads_params(params, *, vocab_tile=2048):
    """Transpose / cast / pad weights once. Returns a dict of device arrays."""
    V, H = params["decoder_weight"].shape

    vt = min(vocab_tile, _round_up(V, 128))
    assert vt % 128 == 0
    Vp = _round_up(V, vt)

    # Decoder (tied embedding) weight -> contiguous bf16 slabs (Vp//vt, H, vt),
    # where slab j equals W_pt[j*vt:(j+1)*vt, :].T, i.e. the (H, vt) block the
    # kernel multiplies by.  One contiguous DMA per grid step.
    w2 = params["decoder_weight"].astype(jnp.bfloat16)              # (V, H)
    if Vp != V:
        w2 = jnp.pad(w2, ((0, Vp - V), (0, 0)))
    w2_slabs = jnp.transpose(w2.reshape(Vp // vt, vt, H), (0, 2, 1))  # (Nv,H,vt)

    b2 = params["decoder_bias"].astype(jnp.float32)
    if Vp != V:
        b2 = jnp.pad(b2, ((0, Vp - V),))

    return {
        "hidden": H,
        "vocab": V,
        "vocab_padded": Vp,
        "vocab_tile": vt,
        "w1": params["transform_dense_w"].T.astype(jnp.bfloat16),    # (H, H) in->out
        "b1": params["transform_dense_b"].astype(jnp.float32).reshape(1, H),
        "gamma": params["ln_gamma"].astype(jnp.float32).reshape(1, H),
        "beta": params["ln_beta"].astype(jnp.float32).reshape(1, H),
        "w2_slabs": w2_slabs,                                         # (Nv, H, vt) bf16
        "b2": b2.reshape(1, Vp),                                      # (1, Vp) f32
        "seq_w": params["seq_rel_w"].T.astype(jnp.float32),           # (H, 2)
        "seq_b": params["seq_rel_b"].astype(jnp.float32),             # (2,)
    }


# ----------------------------------------------------------------------------
# LM prediction head: transform (Linear -> GeLU -> LayerNorm) + tied decoder.
# Grid = (row_tiles [parallel], vocab_tiles [arbitrary]); the transform runs
# once per row tile (vocab index 0), result cached in a bf16 VMEM scratch and
# reused for every vocab slab.
# ----------------------------------------------------------------------------
def _lm_head_kernel(x_ref, w1_ref, b1_ref, g_ref, bb_ref, w2_ref, b2_ref,
                    o_ref, h_ref, *, eps):
    @pl.when(pl.program_id(1) == 0)
    def _():
        # Linear(H, H): bf16 operands, f32 accumulation on the MXU.
        h = jnp.dot(x_ref[...], w1_ref[...], preferred_element_type=jnp.float32)
        h = h + b1_ref[...]
        # Exact (erf) GeLU in f32.
        h = _gelu_exact(h)
        # LayerNorm over features, eps=1e-12, f32; (h - mean) materialized once.
        mean = jnp.mean(h, axis=-1, keepdims=True)
        c = h - mean
        var = jnp.mean(c * c, axis=-1, keepdims=True)
        hn = c * jax.lax.rsqrt(var + eps)
        hn = hn * g_ref[...] + bb_ref[...]
        h_ref[...] = hn.astype(jnp.bfloat16)

    # Decoder GEMM against this vocab slab: bf16 x bf16 -> f32 accumulate,
    # stored in the (bf16) output dtype.
    logits = jnp.dot(h_ref[...], w2_ref[...], preferred_element_type=jnp.float32)
    o_ref[...] = (logits + b2_ref[...]).astype(o_ref.dtype)


def _lm_prediction_head(x, prep, *, eps=1e-12, row_tile=1024,
                        logits_dtype=jnp.bfloat16):
    """x: (N, H).  Returns (N, Vp) logits in `logits_dtype` (vocab padded)."""
    N, H = x.shape
    vt = prep["vocab_tile"]
    Vp = prep["vocab_padded"]

    # Row tile: multiple of 8 sublanes; v5e is already compute-bound near 512,
    # v6e/v7x benefit up to 1024.
    Nr = _round_up(N, 8)
    rt = min(row_tile, Nr)
    # v7x: guarantee >=2 row tiles when possible so the "parallel" row axis
    # can be split across both TensorCores (1 TC on v5e/v6e: harmless).
    if Nr > 8 and (Nr + rt - 1) // rt < 2:
        rt = max(8, _round_up(Nr // 2, 8))
    Np = _round_up(N, rt)

    # Row padding only (activation-dependent, cannot be hoisted); vocab side
    # was fully prepared offline.  bf16 activations halve the x DMA bytes.
    if Np != N:
        x = jnp.pad(x, ((0, Np - N), (0, 0)))
    x_bf = x.astype(jnp.bfloat16)

    kernel = functools.partial(_lm_head_kernel, eps=float(eps))

    out = pl.pallas_call(
        kernel,
        out_shape=jax.ShapeDtypeStruct((Np, Vp), logits_dtype),
        grid_spec=pltpu.PrefetchScalarGridSpec(
            num_scalar_prefetch=0,
            grid=(Np // rt, Vp // vt),
            in_specs=[
                pl.BlockSpec((rt, H), lambda i, j: (i, 0)),       # x tile
                pl.BlockSpec((H, H), lambda i, j: (0, 0)),        # transform W
                pl.BlockSpec((1, H), lambda i, j: (0, 0)),        # transform b
                pl.BlockSpec((1, H), lambda i, j: (0, 0)),        # LN gamma
                pl.BlockSpec((1, H), lambda i, j: (0, 0)),        # LN beta
                pl.BlockSpec((None, H, vt), lambda i, j: (j, 0, 0)),  # W2 slab
                pl.BlockSpec((1, vt), lambda i, j: (0, j)),       # decoder bias
            ],
            out_specs=pl.BlockSpec((rt, vt), lambda i, j: (i, j)),
            scratch_shapes=[pltpu.VMEM((rt, H), jnp.bfloat16)],   # post-LN h
        ),
        compiler_params=pltpu.CompilerParams(
            dimension_semantics=("parallel", "arbitrary"),
            # rt=1024 / vt=2048 with bf16 logits is ~22 MiB double-buffered at
            # BERT-base sizes: above the 16/32 MiB default scoped limits, well
            # under v7x's 64 MiB physical VMEM.
            vmem_limit_bytes=48 * 1024 * 1024),
    )(x_bf, prep["w1"], prep["b1"], prep["gamma"], prep["beta"],
      prep["w2_slabs"], prep["b2"])

    return out


# ----------------------------------------------------------------------------
# BertPreTrainingHeads.forward
# ----------------------------------------------------------------------------
def bert_pretraining_heads(sequence_output, pooled_output, prep, *,
                           eps=1e-12, row_tile=1024,
                           logits_dtype=jnp.bfloat16, trim_padding=True):
    """sequence_output: (B, S, H); pooled_output: (B, H); prep from
    prepare_bert_heads_params().  Returns (prediction_scores, seq_relationship).

    If the vocabulary is already padded to a multiple of 128 (recommended: do
    it at embedding-construction time and mask padded columns in the loss),
    no post-kernel slice/copy of the logits happens at all."""
    B, S, H = sequence_output.shape
    V, Vp = prep["vocab"], prep["vocab_padded"]
    N = B * S

    x = sequence_output.reshape(N, H)
    logits = _lm_prediction_head(x, prep, eps=eps, row_tile=row_tile,
                                 logits_dtype=logits_dtype)
    if logits.shape[0] != N:                      # padded rows (rare)
        logits = logits[:N]
    if trim_padding and Vp != V:                  # padded vocab columns
        logits = logits[:, :V]
        prediction_scores = logits.reshape(B, S, V)
    else:
        prediction_scores = logits.reshape(B, S, Vp)

    # seq_relationship: (B,H) x (H,2) — microseconds of work, plain XLA
    # (a dedicated pallas_call only adds launch overhead + padded-lane compute).
    seq_relationship_score = pooled_output @ prep["seq_w"] + prep["seq_b"]
    return prediction_scores, seq_relationship_score


# ----------------------------------------------------------------------------
# Pure-JAX f32 reference (PyTorch semantics) + test.
# ----------------------------------------------------------------------------
def reference_forward(sequence_output, pooled_output, params, eps=1e-12):
    h = sequence_output @ params["transform_dense_w"].T + params["transform_dense_b"]
    h = _gelu_exact(h)
    mean = h.mean(-1, keepdims=True)
    var = jnp.mean(jnp.square(h - mean), -1, keepdims=True)
    h = (h - mean) / jnp.sqrt(var + eps)
    h = h * params["ln_gamma"] + params["ln_beta"]
    pred = h @ params["decoder_weight"].T + params["decoder_bias"]
    seq = pooled_output @ params["seq_rel_w"].T + params["seq_rel_b"]
    return pred, seq


if __name__ == "__main__":
    batch, seq, hidden, vocab = 2, 8, 32, 50

    key = jax.random.PRNGKey(0)
    ks = jax.random.split(key, 8)
    params = {
        "transform_dense_w": jax.random.normal(ks[0], (hidden, hidden), jnp.float32) * 0.02,
        "transform_dense_b": jax.random.normal(ks[1], (hidden,), jnp.float32) * 0.02,
        "ln_gamma": jnp.ones((hidden,), jnp.float32),
        "ln_beta": jnp.zeros((hidden,), jnp.float32),
        "decoder_weight": jax.random.normal(ks[2], (vocab, hidden), jnp.float32) * 0.02,
        "decoder_bias": jax.random.normal(ks[3], (vocab,), jnp.float32) * 0.02,
        "seq_rel_w": jax.random.normal(ks[4], (2, hidden), jnp.float32) * 0.02,
        "seq_rel_b": jax.random.normal(ks[5], (2,), jnp.float32) * 0.02,
    }
    sequence_output = jax.random.normal(ks[6], (batch, seq, hidden), jnp.float32)
    pooled_output = jax.random.normal(ks[7], (batch, hidden), jnp.float32)

    # One-time weight prep (transpose / cast / pad / slab layout) — NOT per call.
    prepared = prepare_bert_heads_params(params)

    pred, seq_rel = bert_pretraining_heads(sequence_output, pooled_output, prepared)
    pred, seq_rel = jax.block_until_ready((pred, seq_rel))

    pred_ref, seq_ref = reference_forward(sequence_output, pooled_output, params)
    assert pred.shape == (batch, seq, vocab)
    assert pred.dtype == jnp.bfloat16          # bf16 logits per perf review
    assert seq_rel.shape == (batch, 2)

    # bf16 operands / bf16 logits (f32 MXU accumulation) => loosened tolerance.
    pred_f32 = pred.astype(jnp.float32)
    assert jnp.allclose(pred_f32, pred_ref, atol=2e-2, rtol=2e-2), (
        "prediction_scores mismatch, max abs diff = "
        f"{float(jnp.max(jnp.abs(pred_f32 - pred_ref)))}")
    assert jnp.allclose(seq_rel, seq_ref, atol=1e-4, rtol=1e-4), (
        "seq_relationship mismatch, max abs diff = "
        f"{float(jnp.max(jnp.abs(seq_rel - seq_ref)))}")

    print("KERNEL_OK")
</pallas_src>

<mosaic_0001>
module attributes {stable_mosaic.version = 11 : i64} {
  func.func @_lm_head_kernel(%arg0: i32, %arg1: i32, %arg2: memref<8x32xbf16, #tpu.memory_space<vmem>>, %arg3: memref<32x32xbf16, #tpu.memory_space<vmem>>, %arg4: memref<1x32xf32, #tpu.memory_space<vmem>>, %arg5: memref<1x32xf32, #tpu.memory_space<vmem>>, %arg6: memref<1x32xf32, #tpu.memory_space<vmem>>, %arg7: memref<1x32x128xbf16, #tpu.memory_space<vmem>>, %arg8: memref<1x128xf32, #tpu.memory_space<vmem>>, %arg9: memref<8x128xbf16, #tpu.memory_space<vmem>>, %arg10: memref<8x32xbf16, #tpu.memory_space<vmem>>) attributes {dimension_semantics = [#tpu.dimension_semantics<parallel>, #tpu.dimension_semantics<arbitrary>], iteration_bounds = array<i64: 2, 1>, scalar_prefetch = 0 : i64, scratch_operands = 1 : i64, tpu.core_type = #tpu.core_type<tc>, window_params = [{transform_indices = @transform_0, window_bounds = array<i64: 8, 32>}, {pipeline_mode = #tpu.pipeline_mode<synchronous>, transform_indices = @transform_1, window_bounds = array<i64: 32, 32>}, {pipeline_mode = #tpu.pipeline_mode<synchronous>, transform_indices = @transform_2, window_bounds = array<i64: 1, 32>}, {pipeline_mode = #tpu.pipeline_mode<synchronous>, transform_indices = @transform_3, window_bounds = array<i64: 1, 32>}, {pipeline_mode = #tpu.pipeline_mode<synchronous>, transform_indices = @transform_4, window_bounds = array<i64: 1, 32>}, {transform_indices = @transform_5, window_bounds = array<i64: 1, 32, 128>}, {transform_indices = @transform_6, window_bounds = array<i64: 1, 128>}, {transform_indices = @transform_7, window_bounds = array<i64: 8, 128>}]} {
    %c0_i32 = arith.constant 0 : i32
    %0 = arith.cmpi eq, %arg1, %c0_i32 : i32
    %1 = arith.extui %0 : i1 to i32
    %c0_i32_0 = arith.constant 0 : i32
    %2 = arith.cmpi ne, %1, %c0_i32_0 : i32
    scf.if %2 {
      %c0_9 = arith.constant 0 : index
      %c0_10 = arith.constant 0 : index
      %12 = vector.load %arg2[%c0_9, %c0_10] : memref<8x32xbf16, #tpu.memory_space<vmem>>, vector<8x32xbf16>
      %c0_11 = arith.constant 0 : index
      %c0_12 = arith.constant 0 : index
      %13 = vector.load %arg3[%c0_11, %c0_12] : memref<32x32xbf16, #tpu.memory_space<vmem>>, vector<32x32xbf16>
      %cst_13 = arith.constant dense<0.000000e+00> : vector<8x32xf32>
      %14 = tpu.matmul %12, %13, %cst_13 {dimension_numbers = #tpu.dot_dimension_numbers<[1], [0], [0], [1], [0, 0, 1, 1], [], []>} : vector<8x32xbf16>, vector<32x32xbf16>, vector<8x32xf32> -> vector<8x32xf32>
      %c0_14 = arith.constant 0 : index
      %c0_15 = arith.constant 0 : index
      %15 = vector.load %arg4[%c0_14, %c0_15] : memref<1x32xf32, #tpu.memory_space<vmem>>, vector<1x32xf32>
      %16 = vector.broadcast %15 : vector<1x32xf32> to vector<8x32xf32>
      %17 = arith.addf %14, %16 : vector<8x32xf32>
      %cst_16 = arith.constant 5.000000e-01 : f32
      %18 = vector.broadcast %cst_16 : f32 to vector<8x32xf32>
      %19 = arith.mulf %17, %18 : vector<8x32xf32>
      %cst_17 = arith.constant 0.707106769 : f32
      %20 = vector.broadcast %cst_17 : f32 to vector<8x32xf32>
      %21 = arith.mulf %17, %20 : vector<8x32xf32>
      %22 = math.erf %21 : vector<8x32xf32>
      %cst_18 = arith.constant 1.000000e+00 : f32
      %23 = vector.broadcast %cst_18 : f32 to vector<8x32xf32>
      %24 = arith.addf %23, %22 : vector<8x32xf32>
      %25 = arith.mulf %19, %24 : vector<8x32xf32>
      %cst_19 = arith.constant dense<0.000000e+00> : vector<8xf32>
      %26 = vector.multi_reduction <add>, %25, %cst_19 [1] : vector<8x32xf32> to vector<8xf32>
      %27 = vector.shape_cast %26 : vector<8xf32> to vector<8x1xf32>
      %cst_20 = arith.constant 3.200000e+01 : f32
      %28 = vector.broadcast %cst_20 : f32 to vector<8x1xf32>
      %29 = arith.divf %27, %28 : vector<8x1xf32>
      %30 = vector.broadcast %29 : vector<8x1xf32> to vector<8x32xf32>
      %31 = arith.subf %25, %30 : vector<8x32xf32>
      %32 = arith.mulf %31, %31 : vector<8x32xf32>
      %cst_21 = arith.constant dense<0.000000e+00> : vector<8xf32>
      %33 = vector.multi_reduction <add>, %32, %cst_21 [1] : vector<8x32xf32> to vector<8xf32>
      %34 = vector.shape_cast %33 : vector<8xf32> to vector<8x1xf32>
      %cst_22 = arith.constant 3.200000e+01 : f32
      %35 = vector.broadcast %cst_22 : f32 to vector<8x1xf32>
      %36 = arith.divf %34, %35 : vector<8x1xf32>
      %cst_23 = arith.constant 9.99999996E-13 : f32
      %37 = vector.broadcast %cst_23 : f32 to vector<8x1xf32>
      %38 = arith.addf %36, %37 : vector<8x1xf32>
      %39 = math.rsqrt %38 : vector<8x1xf32>
      %40 = vector.broadcast %39 : vector<8x1xf32> to vector<8x32xf32>
      %41 = arith.mulf %31, %40 : vector<8x32xf32>
      %c0_24 = arith.constant 0 : index
      %c0_25 = arith.constant 0 : index
      %42 = vector.load %arg5[%c0_24, %c0_25] : memref<1x32xf32, #tpu.memory_space<vmem>>, vector<1x32xf32>
      %43 = vector.broadcast %42 : vector<1x32xf32> to vector<8x32xf32>
      %44 = arith.mulf %41, %43 : vector<8x32xf32>
      %c0_26 = arith.constant 0 : index
      %c0_27 = arith.constant 0 : index
      %45 = vector.load %arg6[%c0_26, %c0_27] : memref<1x32xf32, #tpu.memory_space<vmem>>, vector<1x32xf32>
      %46 = vector.broadcast %45 : vector<1x32xf32> to vector<8x32xf32>
      %47 = arith.addf %44, %46 : vector<8x32xf32>
      %48 = arith.truncf %47 : vector<8x32xf32> to vector<8x32xbf16>
      %c0_28 = arith.constant 0 : index
      %c0_29 = arith.constant 0 : index
      %49 = vector.load %arg10[%c0_28, %c0_29] : memref<8x32xbf16, #tpu.memory_space<vmem>>, vector<8x32xbf16>
      tpu.vector_store %arg10[%c0_28, %c0_29], %48 {strides = array<i32>} : memref<8x32xbf16, #tpu.memory_space<vmem>>, vector<8x32xbf16>,
    } else {
    }
    %c0 = arith.constant 0 : index
    %c0_1 = arith.constant 0 : index
    %3 = vector.load %arg10[%c0, %c0_1] : memref<8x32xbf16, #tpu.memory_space<vmem>>, vector<8x32xbf16>
    %c0_2 = arith.constant 0 : index
    %c0_3 = arith.constant 0 : index
    %c0_4 = arith.constant 0 : index
    %4 = vector.load %arg7[%c0_2, %c0_3, %c0_4] : memref<1x32x128xbf16, #tpu.memory_space<vmem>>, vector<1x32x128xbf16>
    %5 = vector.shape_cast %4 : vector<1x32x128xbf16> to vector<32x128xbf16>
    %cst = arith.constant dense<0.000000e+00> : vector<8x128xf32>
    %6 = tpu.matmul %3, %5, %cst {dimension_numbers = #tpu.dot_dimension_numbers<[1], [0], [0], [1], [0, 0, 1, 1], [], []>} : vector<8x32xbf16>, vector<32x128xbf16>, vector<8x128xf32> -> vector<8x128xf32>
    %c0_5 = arith.constant 0 : index
    %c0_6 = arith.constant 0 : index
    %7 = vector.load %arg8[%c0_5, %c0_6] : memref<1x128xf32, #tpu.memory_space<vmem>>, vector<1x128xf32>
    %8 = vector.broadcast %7 : vector<1x128xf32> to vector<8x128xf32>
    %9 = arith.addf %6, %8 : vector<8x128xf32>
    %10 = arith.truncf %9 : vector<8x128xf32> to vector<8x128xbf16>
    %c0_7 = arith.constant 0 : index
    %c0_8 = arith.constant 0 : index
    %11 = vector.load %arg9[%c0_7, %c0_8] : memref<8x128xbf16, #tpu.memory_space<vmem>>, vector<8x128xbf16>
    tpu.vector_store %arg9[%c0_7, %c0_8], %10 {strides = array<i32>} : memref<8x128xbf16, #tpu.memory_space<vmem>>, vector<8x128xbf16>,
    return
  }
  func.func @transform_0(%arg0: i32, %arg1: i32) -> (i32, i32) {
    %c0_i32 = arith.constant 0 : i32
    %c0_i32_0 = arith.constant 0 : i32
    return %arg0, %c0_i32 : i32, i32
  }
  func.func @transform_1(%arg0: i32, %arg1: i32) -> (i32, i32) {
    %c0_i32 = arith.constant 0 : i32
    %c0_i32_0 = arith.constant 0 : i32
    %c0_i32_1 = arith.constant 0 : i32
    return %c0_i32, %c0_i32_0 : i32, i32
  }
  func.func @transform_2(%arg0: i32, %arg1: i32) -> (i32, i32) {
    %c0_i32 = arith.constant 0 : i32
    %c0_i32_0 = arith.constant 0 : i32
    %c0_i32_1 = arith.constant 0 : i32
    return %c0_i32, %c0_i32_0 : i32, i32
  }
  func.func @transform_3(%arg0: i32, %arg1: i32) -> (i32, i32) {
    %c0_i32 = arith.constant 0 : i32
    %c0_i32_0 = arith.constant 0 : i32
    %c0_i32_1 = arith.constant 0 : i32
    return %c0_i32, %c0_i32_0 : i32, i32
  }
  func.func @transform_4(%arg0: i32, %arg1: i32) -> (i32, i32) {
    %c0_i32 = arith.constant 0 : i32
    %c0_i32_0 = arith.constant 0 : i32
    %c0_i32_1 = arith.constant 0 : i32
    return %c0_i32, %c0_i32_0 : i32, i32
  }
  func.func @transform_5(%arg0: i32, %arg1: i32) -> (i32, i32, i32) {
    %c0_i32 = arith.constant 0 : i32
    %c0_i32_0 = arith.constant 0 : i32
    %c0_i32_1 = arith.constant 0 : i32
    return %arg1, %c0_i32, %c0_i32_0 : i32, i32, i32
  }
  func.func @transform_6(%arg0: i32, %arg1: i32) -> (i32, i32) {
    %c0_i32 = arith.constant 0 : i32
    %c0_i32_0 = arith.constant 0 : i32
    return %c0_i32, %arg1 : i32, i32
  }
  func.func @transform_7(%arg0: i32, %arg1: i32) -> (i32, i32) {
    %c0_i32 = arith.constant 0 : i32
    return %arg0, %arg1 : i32, i32
  }
}

</mosaic_0001>

<bundles_post_ra>
// kernel: tpu_custom_call.1
= control target key start
LH: loop header
LB: loop body
LE: loop exit
PB: predicated region body
PF: predicated region fallthrough
CT: control target
= control target key end

     0   :  { %12 = vsyncpa [#allocation4], 0  ;;  %s1332_s0 = inlined_call_operand.hbm [shape: bf16[16,32], index: 0, kind: input, shape index: {}]   ;;  %s1333_s1 = inlined_call_operand.hbm [shape: bf16[32,32], index: 1, kind: input, shape index: {}]   ;;  %s1334_s2 = inlined_call_operand.vmem [shape: f32[1,32], index: 2, kind: input, shape index: {}]   ;;  %s1335_s3 = inlined_call_operand.vmem [shape: f32[1,32], index: 3, kind: input, shape index: {}]   ;;  %s1336_s4 = inlined_call_operand.hbm [shape: f32[1,32], index: 4, kind: input, shape index: {}]   ;;  %s1337_s5 = inlined_call_operand.vmem [shape: bf16[1,32,128], index: 5, kind: input, shape index: {}]   ;;  %s1338_s6 = inlined_call_operand.vmem [shape: f32[1,128], index: 6, kind: input, shape index: {}]   ;;  %s1339_s7 = inlined_call_operand.hbm [shape: bf16[16,128], index: 7, kind: output, shape index: {}]  }
   0x1   :  { %14 = vsyncpa [#allocation4 + $0x1], 0 }
   0x2   :  { %15 = vsyncpa [#allocation7], 0 }
   0x3   :  { %16 = vsyncpa [#allocation5], 0 }
   0x4   :  { %18 = vsyncpa [#allocation5 + $0x1], 0  ;;  %s1058_s24 = smov 0   ;;  %s1060_s25 = smov 0  }
   0x5   :  { %s1062_s26 = smov 0   ;;  %s1064_s27 = smov 0  }
   0x6   :  { %s1066_s28 = smov 0   ;;  %s1068_s29 = smov 0  }
   0x7 LB: > { %1346 = sst [smem:[#allocation13_spill]] %s988_s24  ;;  %s690_s30 = sadd.s32 4294967295, %s1008_s29   ;;  %s1008_s29 = sphi %s1068_s29, %s24_s29   ;;  %s1004_s28 = sphi %s1066_s28, %s1367_s28   ;;  %s1000_s27 = sphi %s1064_s27, %s1366_s27   ;;  %s996_s26 = sphi %s1062_s26, %s1365_s26   ;;  %s992_s25 = sphi %s1060_s25, %s1364_s25   ;;  %s988_s24 = sphi %s1058_s24, %s1363_s24  }
   0x8   : > { %s691_s8 = sadd.s32 4294967294, %s1008_s29   ;;  %p56_p0 = scmp.ne.s32.totalorder %s992_s25, %s988_s24 }
   0x9   : > { %p1092_p1 = scmp.eq.s32.totalorder %s690_s30, 0  ;;  %p1096_p2 = scmp.eq.s32.totalorder %s690_s30, 1 }
   0xa   : > { %p224_p3 = scmp.eq.s32.totalorder %s691_s8, 1  ;;  %p692_p5 = scmp.ge.s32.totalorder %s1008_s29, 1 }
   0xb   : > { %s1347_s9 = scalar_select %p1092_p1, 1, 0 }
   0xc   : > { %p1102_p4 = por %p1092_p1, %p56_p0  ;;  %p1107_p6 = por %p224_p3, %p56_p0 }
   0xd   : > { %p231_p7 = scmp.lt.s32.totalorder %s1008_s29, 3  ;;  %s1010_s14 = smov [#allocation6]  }
   0xe   : > { %s1349_s11 = scalar_select %p1102_p4, 1, 0 }
   0xf   : > { %s1350_s12 = scalar_select %p1107_p6, 1, 0 }
  0x10   : > { %p1112_p8 = pnand %p692_p5, %p231_p7  ;;  %s243_s15 = sshll.u32 %s1010_s14, 4  ;;  %s1116_s15 = int_to_ptr.vmem [resolvable:$true] %s243_s15 }
  0x11   : > { %1351 = sst [smem:[#allocation14_spill]] %s1350_s12  ;;  %s1011_s17 = smov [#allocation8]  }
  0x12   : > { %p753_p9 = pneg %p1112_p8  ;;  %s263_s18 = sshll.u32 %s1011_s17, 4  ;;  %s1127_s18 = int_to_ptr.vmem [resolvable:$true] %s263_s18 }
  0x13   : > { %s836_s21 = scalar_lea.hbm %s1333_s1, 256 }
  0x14   : > { %p1123_p11 = pnand %p753_p9, %p1092_p1  ;;  %p837_p12 = scmp.ne.s32.totalorder %s1333_s1, %s836_s21 }
  0x15   : > { %p843_p5 = scmp.lt.u32.totalorder %s836_s21, %s1333_s1 }
  0x16   : > { %p838_p13 = pneg %p1123_p11 }
  0x18   : > { %p839_p0 = pnand %p838_p13, %p837_p12 }
  0x1a   : > { %p840_p3 = pneg %p839_p0 }
  0x1c   : > { %p845_p7 = pnand %p843_p5, %p840_p3 }
  0x1e   : > { %848 = shalt.err (!%p845_p7)
}
  0x1f   : > { %s849_s14 = scalar_lea.vmem %s1116_s15, 256  ;;  %p857_p1 = scmp.lt.s32.totalorder %s1116_s15, %s1116_s15 }
  0x20   : > { %p850_p9 = scmp.ne.s32.totalorder %s1116_s15, %s849_s14  ;;  %p858_p12 = scmp.lt.s32.totalorder %s849_s14, %s849_s14 }
  0x22   : > { %p852_p10 = pnand %p850_p9, %p838_p13  ;;  %p859_p0 = por %p858_p12, %p857_p1 }
  0x24   : > { %p853_p6 = pneg %p852_p10 }
  0x26   : > { %p860_p4 = pnand %p859_p0, %p853_p6 }
  0x28   : > { %863 = shalt.err (!%p860_p4)
}
  0x29   : > { %s1012_s17 = smov 64   ;;  %s1013_s19 = smov 4  }
  0x2a   : > { %756 = dma.hbm_to_vmem [thread:$0]  (!%p1123_p11), %s1333_s1, 256, %s1116_s15, [#allocation7], %s1012_s17, %s1012_s17, %s1013_s19  }
  0x2b   : > { %s864_s30 = scalar_lea.hbm %s1336_s4, 16 }
  0x2c   : > { %p865_p1 = scmp.ne.s32.totalorder %s1336_s4, %s864_s30  ;;  %p871_p10 = scmp.lt.u32.totalorder %s864_s30, %s1336_s4 }
  0x2e   : > { %p867_p4 = pnand %p865_p1, %p838_p13 }
  0x30   : > { %p868_p6 = pneg %p867_p4 }
  0x32   : > { %p873_p3 = pnand %p871_p10, %p868_p6 }
  0x34   : > { %876 = shalt.err (!%p873_p3)
}
  0x35   : > { %s877_s15 = scalar_lea.vmem %s1127_s18, 16  ;;  %s884_s12 = scalar_lea.vmem %s1127_s18, 32 }
  0x36   : > { %p878_p5 = scmp.ne.s32.totalorder %s1127_s18, %s877_s15  ;;  %p885_p12 = scmp.lt.s32.totalorder %s1127_s18, %s1127_s18 }
  0x37   : > { %p886_p0 = scmp.lt.s32.totalorder %s884_s12, %s877_s15 }
  0x38   : > { %p880_p7 = pnand %p878_p5, %p838_p13 }
  0x39   : > { %p887_p1 = por %p886_p0, %p885_p12 }
  0x3a   : > { %p881_p9 = pneg %p880_p7 }
  0x3c   : > { %p888_p4 = pnand %p887_p1, %p881_p9 }
  0x3e   : > { %891 = shalt.err (!%p888_p4)
}
  0x3f   : > { %759 = dma.hbm_to_vmem [thread:$0]  (!%p1123_p11), %s1336_s4, 16, %s1127_s18, [#allocation7]  }
  0x40   : > { %s36_s19 = sadd.s32 1, %s1004_s28  ;;  %s43_s20 = sadd.s32 1, %s996_s26 }
  0x41   : > { %p38_p13 = scmp.ge.s32.totalorder %s36_s19, 2  ;;  %p50_p6 = scmp.ne.s32.totalorder %s996_s26, %s992_s25 }
  0x42   : > { %p51_p10 = scmp.eq.s32.totalorder %s1008_s29, 0  ;;  %p770_p3 = scmp.lt.s32.totalorder %s1008_s29, 2 }
  0x43   : > { %s1369_s19 = smov (%p38_p13, %s36_s19), 0  ;;  %p1192_p7 = por %p1096_p2, %p50_p6 }
  0x44   : > { %p52_p5 = por %p51_p10, %p50_p6  ;;  %s40_s21 = ssub.s32 %s1004_s28, %s1369_s19 }
  0x45   : > { %s1354_s16 = scalar_select %p1192_p7, 1, 0 }
  0x46   : > { %s288_s22 = sand.u32 1, %s996_s26   ;;  %p41_p9 = scmp.eq.s32.totalorder %s40_s21, 0 }
  0x47   : > { %s698_s18 = sshll.u32 %s288_s22, 2  ;;  %s699_s23 = sshll.u32 %s1004_s28, 6 }
  0x48   : > { %s1201_s30 = scalar_select %p41_p9, %s996_s26, %s43_s20  }
  0x49   : > { %s1206_s15 = scalar_lea.hbm %s1332_s0, %s699_s23  ;;  %s292_s10 = scalar_lea.vmem [#allocation3], %s698_s18 }
  0x4a   : > { %s299_s12 = sshll.u32 %s292_s10, 4  ;;  %p1210_p2 = pnand %p770_p3, %p52_p5  ;;  %s1214_s12 = int_to_ptr.vmem [resolvable:$true] %s299_s12 }
  0x4b   : > { %s289_s17 = scalar_lea.sflag [#allocation4], %s288_s22  ;;  %s892_s20 = scalar_lea.hbm %s1206_s15, 64 }
  0x4c   : > { %p893_p11 = scmp.ne.s32.totalorder %s1206_s15, %s892_s20  ;;  %p894_p12 = pneg %p1210_p2 }
  0x4d   : > { %s897_s23 = scalar_lea.hbm %s1332_s0, 128  ;;  %p898_p4 = scmp.lt.u32.totalorder %s1206_s15, %s1332_s0 }
  0x4e   : > { %p895_p0 = pnand %p894_p12, %p893_p11  ;;  %p899_p13 = scmp.lt.u32.totalorder %s897_s23, %s892_s20 }
  0x4f   : > { %p901_p10 = scmp.lt.u32.totalorder %s892_s20, %s1206_s15 }
  0x50   : > { %p896_p1 = pneg %p895_p0  ;;  %p900_p6 = por %p899_p13, %p898_p4 }
  0x52   : > { %p902_p3 = por %p901_p10, %p900_p6 }
  0x54   : > { %p903_p5 = pnand %p902_p3, %p896_p1 }
  0x56   : > { %906 = shalt.err (!%p903_p5)
}
  0x57   : > { %s907_s22 = scalar_lea.vmem %s1214_s12, 64  ;;  %s1014_s10 = smov [#allocation3]  }
  0x58   : > { %p908_p9 = scmp.ne.s32.totalorder %s1214_s12, %s907_s22  ;;  %s912_s21 = sshll.u32 %s1014_s10, 4  ;;  %s913_s21 = int_to_ptr.vmem [resolvable:$false] %s912_s21 }
  0x59   : > { %s914_s18 = scalar_lea.vmem %s913_s21, 128  ;;  %p915_p7 = scmp.lt.s32.totalorder %s1214_s12, %s913_s21 }
  0x5a   : > { %p910_p11 = pnand %p908_p9, %p894_p12  ;;  %p916_p4 = scmp.lt.s32.totalorder %s914_s18, %s907_s22 }
  0x5c   : > { %p911_p0 = pneg %p910_p11  ;;  %p917_p13 = por %p916_p4, %p915_p7 }
  0x5e   : > { %p918_p6 = pnand %p917_p13, %p911_p0 }
  0x60   : > { %921 = shalt.err (!%p918_p6)
}
  0x61   : > { %763 = dma.hbm_to_vmem [thread:$0]  (!%p1210_p2), %s1206_s15, 64, %s1214_s12, %s289_s17  }
  0x62   : > { %308 = sbr.rel (%p1112_p8) target bundleno = 903 (0x387), region = 48  ;;  %s1244_s20 = sand.u32 (!%p1112_p8), 1, %s992_s25  }
  0x63   : > { %s701_s23 = sshll.u32 (!%p1112_p8), %s1244_s20, 2  ;;  %s311_s8 = scalar_lea.sflag (!%p1112_p8), [#allocation4], %s1244_s20 }
  0x64   : > { %s314_s14 = scalar_lea.vmem (!%p1112_p8), [#allocation3], %s701_s23  ;;  %p1356_p7 = scmp.ne.s32.totalorder (!%p1112_p8), %s1349_s11, 0 }
  0x69   : > { %975 = dma.done.wait (%p1356_p7), %s311_s8, 64  }
  0x6a   : > { %977 = vsyncadd (%p1356_p7), %s311_s8, 4294967232  ;;  %p1357_p2 = scmp.ne.s32.totalorder %s1347_s9, 0 }
  0x6c   : > { %979 = dma.done.wait (%p1357_p2), [#allocation7], 272  }
  0x6d   : > { %981 = vsyncadd (%p1357_p2), [#allocation7], 4294967024  ;;  %v1015_v0 = vmov 0.0   ;;  %vm1016_vm0 = vmmov 0   ;;  %v828_v1 = vld [vmem:[#allocation6] sm:$0xff]   ;;  %v829_v2 = vld [vmem:[#allocation6 + $0x8] sm:$0xff]  }
  0x6e   : > { %725 = vmatprep.subr.bf16.mxu0 %v1015_v0  ;;  %729 = vmatprep.mubr.msk.bf16.mxu0 %vm1016_vm0, %v1015_v0  ;;  %v374_v3 = vld [vmem:[%s314_s14] sm:$0xf]  ;;  %vm398_vm1 = vcmask 261120   ;;  %v705_v4 = vld [vmem:[%s1334_s2] ss:$0 sm:$0xff]  ;;  %v831_v22 = vld [vmem:[%s1337_s5 + $0x8] sm:$0xff]  }
  0x6f   : > { %733 = vmatprep.subr.bf16.mxu1 %v1015_v0  ;;  %737 = vmatprep.mubr.msk.bf16.mxu1 %vm1016_vm0, %v1015_v0  ;;  %v830_v21 = vld [vmem:[%s1337_s5] sm:$0xff]   ;;  %v710_v29 = vld [vmem:[#allocation8] ss:$0 sm:$0xff]  ;;  %vm478_vm2 = vcmask 257024   ;;  %s716_s18 = sshll.u32 %s1000_s27, 6  ;;  %s360_s8 = scalar_lea.vmem [#allocation9], %s701_s23 }
  0x70   : > { %726 = vmatpush3.bf16.msra.mxu0 %v828_v1  ;;  %734 = vmatpush3.bf16.msra.mxu1 %v830_v21  ;;  %v709_v27 = vld [vmem:[%s1335_s3] ss:$0 sm:$0xff]  ;;  %s565_s14 = sshll.u32 %s360_s8, 4  ;;  %s1283_s9 = scalar_lea.hbm %s1339_s7, %s716_s18  ;;  %s1285_s14 = int_to_ptr.vmem [resolvable:$true] %s565_s14 }
  0x71   : > { %727 = vmatprep.subr.bf16.mxu0 %v1015_v0  ;;  %735 = vmatprep.subr.bf16.mxu1 %v1015_v0  ;;  %v711_v34 = vld [vmem:[%s1338_s6] ss:$0 sm:$0xff]  ;;  %s551_s27 = scalar_lea.sflag [#allocation5], %s1244_s20  ;;  %s922_s15 = scalar_lea.vmem %s1285_s14, 64 }
  0x72   : > { %p923_p8 = scmp.ne.s32.totalorder %s1285_s14, %s922_s15  ;;  %p1358_p12 = scmp.ne.s32.totalorder %s1354_s16, 0 }
  0x73   : > { %s1017_s23 = smov [#allocation9]  }
  0x74   : > { %728 = vmatpush3.bf16.msra.mxu0 %v829_v2  ;;  %736 = vmatpush3.bf16.msra.mxu1 %v831_v22  ;;  %p924_p1 = pnand %p923_p8, %p1358_p12  ;;  %s926_s12 = sshll.u32 %s1017_s23, 4  ;;  %s927_s12 = int_to_ptr.vmem [resolvable:$false] %s926_s12 }
  0x75   : > { %s928_s24 = scalar_lea.vmem %s927_s12, 128  ;;  %p929_p3 = scmp.lt.s32.totalorder %s1285_s14, %s927_s12 }
  0x76   : > { %p925_p10 = pneg %p924_p1  ;;  %p930_p5 = scmp.lt.s32.totalorder %s928_s24, %s922_s15 }
  0x77   : > { %730 = vmatmul.mubr.msk.bf16.vlgmr.msra.gmra.mrb[0].mxu0 %vm398_vm1, %v374_v3 }
  0x78   : > { %p931_p9 = por %p930_p5, %p929_p3 }
  0x7a   : > { %p932_p11 = pnand %p931_p9, %p925_p10 }
 0x14a   : > { %v436_v5 = vpop.f32.mrb[0].mxu0 }
 0x14b   : > { %v437_v6 = vadd.f32 %v705_v4, %v436_v5  ;;  %v731_v7 = vpop.f32.mrb[1].mxu0 }
 0x14c   : > { %v439_v8 = vpop.f32.mrb[2].mxu0 }
 0x14d   : > { %v443_v9 = vmul.f32 0.70710677, %v437_v6  ;;  %v732_v10 = vpop.f32.mrb[3].mxu0  ;;  %v442_v12 = vmul.f32 0.5, %v437_v6 }
 0x14f   : > { %832 = verf.f32 %v443_v9 }
 0x159   : > { %v833_v11 = vpop.eup %832 }
 0x15a   : > { %v445_v13 = vadd.f32 1.0, %v833_v11 }
 0x15c   : > { %v446_v14 = vmul.f32 %v445_v13, %v442_v12 }
 0x15e   : > { %v447_v15 = vsel %vm398_vm1, %v446_v14, 0.0 }
 0x15f   : > { %448 = vadd.xlane.f32.xlu0 %v447_v15 }
 0x1ec   : > { %v449_v16 = vpop.xlane.xlu0 %448 }
 0x1ed   : > { %v451_v17 = vmul.f32 0.03125, %v449_v16 }
 0x1ef   : > { %v452_v18 = vsub.f32 %v446_v14, %v451_v17 }
 0x1f1   : > { %v453_v19 = vmul.f32 %v452_v18, %v452_v18 }
 0x1f3   : > { %v454_v20 = vsel %vm398_vm1, %v453_v19, 0.0 }
 0x1f4   : > { %455 = vadd.xlane.f32.xlu0 %v454_v20 }
 0x281   : > { %v456_v23 = vpop.xlane.xlu0 %455 }
 0x282   : > { %v457_v24 = vmul.f32 0.03125, %v456_v23 }
 0x284   : > { %v458_v25 = vadd.f32 1e-12, %v457_v24 }
 0x286   : > { %834 = vrsqrt.f32 %v458_v25 }
 0x290   : > { %v835_v26 = vpop.eup %834 }
 0x291   : > { %v460_v28 = vmul.f32 %v835_v26, %v452_v18 }
 0x293   : > { %v468_v30 = vmul.f32 %v709_v27, %v460_v28 }
 0x295   : > { %v476_v31 = vadd.f32 %v710_v29, %v468_v30 }
 0x297   : > { %v477_v32 = vpack.c.bf16 %v476_v31, %v476_v31 }
 0x299   : > { %479 = vst.msk [vmem:[#allocation2] sm:$0xf] %vm478_vm2, %v477_v32 }
 0x2a0   : > { %v480_v33 = vld [vmem:[#allocation2] sm:$0xf] }
 0x2a1   : > { %738 = vmatmul.mubr.msk.bf16.vlgmr.msra.gmra.mrb[0].mxu1 %vm398_vm1, %v480_v33 }
 0x374   : > { %v542_v35 = vpop.f32.mrb[0].mxu1 }
 0x375   : > { %v543_v36 = vadd.f32 %v711_v34, %v542_v35  ;;  %v739_v37 = vpop.f32.mrb[1].mxu1 }
 0x376   : > { %v545_v38 = vpop.f32.mrb[2].mxu1 }
 0x377   : > { %v548_v39 = vpack.c.bf16 %v543_v36, %v543_v36  ;;  %v740_v40 = vpop.f32.mrb[3].mxu1 }
 0x379   : > { %549 = vst [vmem:[%s360_s8] sm:$0xf] %v548_v39 }
 0x37a   : > { %935 = shalt.err (!%p932_p11)
}
 0x37b   : > { %s936_s20 = scalar_lea.hbm %s1283_s9, 64  ;;  %s940_s10 = scalar_lea.hbm %s1339_s7, 128 }
 0x37c   : > { %p937_p0 = scmp.ne.s32.totalorder %s1283_s9, %s936_s20  ;;  %p941_p6 = scmp.lt.u32.totalorder %s1283_s9, %s1339_s7 }
 0x37d   : > { %p942_p7 = scmp.lt.u32.totalorder %s940_s10, %s936_s20  ;;  %p944_p8 = scmp.lt.u32.totalorder %s936_s20, %s1283_s9 }
 0x37e   : > { %p938_p4 = pnand %p937_p0, %p1358_p12 }
 0x37f   : > { %p943_p2 = por %p942_p7, %p941_p6 }
 0x380   : > { %p939_p13 = pneg %p938_p4 }
 0x381   : > { %p945_p1 = por %p944_p8, %p943_p2 }
 0x383   : > { %p946_p10 = pnand %p945_p1, %p939_p13 }
 0x385   : > { %949 = shalt.err (!%p946_p10)
}
 0x386   : > { %751 = dma.vmem_to_hbm [thread:$0]  (%p1358_p12), %s1285_s14, 64, %s1283_s9, %s551_s27  }
 0x387 PF: > { %s1359_s8 = sld [smem:[#allocation13_spill]]  ;;  %s1360_s11 = sld [smem:[#allocation14_spill]] }
 0x388   : > { %p1362_p5 = scmp.ge.s32.totalorder %s1008_s29, 2 }
 0x38d   : > { %s577_s13 = sand.u32 1, %s1359_s8   ;;  %p1361_p3 = scmp.ne.s32.totalorder %s1360_s11, 0 }
 0x38e   : > { %s578_s15 = scalar_lea.sflag [#allocation5], %s577_s13 }
 0x38f   : > { %p765_p9 = pnand %p1362_p5, %p1361_p3 }
 0x391   : > { %983 = dma.done.wait (!%p765_p9), %s578_s15, 64  }
 0x392   : > { %985 = vsyncadd (!%p765_p9), %s578_s15, 4294967232  ;;  %s24_s29 = sadd.s32 1, %s1008_s29   ;;  %s1363_s24 = smov %s992_s25 }
 0x393   : > { %p21_p11 = scmp.ge.s32.totalorder %s24_s29, 4   ;;  %s1364_s25 = smov %s996_s26 }
 0x394   : > { %s1365_s26 = smov %s1201_s30  ;;  %s1366_s27 = smov %s1004_s28 }
 0x395   : > { %s1367_s28 = smov %s1369_s19  ;;  %23 = sbr.rel (!%p21_p11) target bundleno = 7 (0x7), region = 111 }
 0x39c   :  { %583 = vsyncpa [#allocation4], 1 }
 0x39d   :  { %585 = vsyncpa [#allocation4 + $0x1], 1 }
 0x39e   :  { %586 = vsyncpa [#allocation7], 1 }
 0x39f   :  { %587 = vsyncpa [#allocation5], 1 }
 0x3a0   :  { %589 = vsyncpa [#allocation5 + $0x1], 1 }

</bundles_post_ra>
